<compile_context>
chip_gen: v7x
topology: tpu7x:2x2x1
jax: 0.10.0
libtpu: 0.0.40
codegen_flags: <defaults>
</compile_context>

<pallas_src>
import jax
import jax.numpy as jnp
from jax.experimental import pallas as pl
from jax.experimental.pallas import tpu as pltpu


# dtype itemsize (bytes) -> native sublane packing (rows per vreg tile).
_SUBLANE = {1: 32, 2: 16, 4: 8}

_DMA_CHUNK_BYTES = 8 * 1024 * 1024      # ~8 MiB per outstanding DMA
_MAX_DMA_CHUNKS = 8                     # enough in-flight DMAs for HBM BW

_TARGET_BLOCK_BYTES = 6 * 1024 * 1024   # tiled-fallback block size
_VMEM_LIMIT_BYTES = 48 * 1024 * 1024    # tiled-fallback scoped VMEM (safe on v7x)


# ----------------------------------------------------------------------------
# Primary path: chunked HBM -> HBM DMA, no grid, no VMEM.
# ----------------------------------------------------------------------------
def _make_dma_kernel(row_splits):
    """row_splits: tuple of (start, size) slices along axis 0, or None for a
    single whole-array copy."""

    def kernel(x_ref, o_ref, sems):
        if row_splits is None:
            cp = pltpu.make_async_copy(x_ref, o_ref, sems.at[0])
            cp.start()
            cp.wait()
            return
        copies = [
            pltpu.make_async_copy(
                x_ref.at[pl.ds(start, size)],
                o_ref.at[pl.ds(start, size)],
                sems.at[i],
            )
            for i, (start, size) in enumerate(row_splits)
        ]
        for cp in copies:   # issue all DMAs (overlapped) ...
            cp.start()
        for cp in copies:   # ... then drain them.
            cp.wait()

    return kernel


def _row_splits(shape, itemsize):
    """Static chunking of axis 0 into <= _MAX_DMA_CHUNKS pieces."""
    if len(shape) < 2 or shape[0] <= 1:
        return None
    lead = shape[0]
    row_bytes = itemsize
    for d in shape[1:]:
        row_bytes *= d
    total_bytes = lead * row_bytes
    n = min(_MAX_DMA_CHUNKS, lead, max(1, -(-total_bytes // _DMA_CHUNK_BYTES)))
    if n <= 1:
        return None
    rows = -(-lead // n)
    if len(shape) == 2:
        # axis 0 is the sublane axis of the tiled HBM layout: keep chunk
        # boundaries tile-aligned.
        sub = _SUBLANE.get(itemsize, 8)
        rows = -(-rows // sub) * sub
    splits = []
    start = 0
    while start < lead:
        size = min(rows, lead - start)
        splits.append((start, size))
        start += size
    return tuple(splits)


def _identity_dma(x):
    itemsize = x.dtype.itemsize
    splits = _row_splits(x.shape, itemsize)
    n_sems = 1 if splits is None else len(splits)
    return pl.pallas_call(
        _make_dma_kernel(splits),
        out_shape=jax.ShapeDtypeStruct(x.shape, x.dtype),
        in_specs=[pl.BlockSpec(memory_space=pl.ANY)],
        out_specs=pl.BlockSpec(memory_space=pl.ANY),
        scratch_shapes=[pltpu.SemaphoreType.DMA((n_sems,))],
        cost_estimate=pl.CostEstimate(
            flops=0, transcendentals=0, bytes_accessed=2 * x.size * itemsize),
    )(x)


# ----------------------------------------------------------------------------
# Fallback path: lane-dense tiled VMEM copy (only used if HBM->HBM DMA
# lowering is unavailable on the installed jaxlib).
# ----------------------------------------------------------------------------
def _tiled_copy_kernel(x_ref, o_ref):
    o_ref[...] = x_ref[...]


def _identity_tiled(x):
    orig_shape = x.shape
    total = x.size
    itemsize = x.dtype.itemsize
    sub = _SUBLANE.get(itemsize, 8)
    C = next((c for c in (2048, 1024, 512, 256, 128) if total % c == 0), None)

    if C is not None:
        R = total // C
        x2 = x.reshape(R, C)
        tr = max(sub, (_TARGET_BLOCK_BYTES // (C * itemsize)) // sub * sub)
        if tr >= R:
            tr = R
        elif R % tr:
            # Prefer a divisor of R so the tail store stays a full-width vst.
            for cand in range(tr, max(sub, tr // 2) - 1, -sub):
                if R % cand == 0:
                    tr = cand
                    break
        grid = (pl.cdiv(R, tr),)
        spec = pl.BlockSpec((tr, C), lambda i: (i, 0))
        out_shape = jax.ShapeDtypeStruct((R, C), x.dtype)
    else:
        # Not a multiple of 128: lane-only layout.  A (1, tc) block pads to
        # `sub` sublanes in VMEM, so budget for that padding.
        x2 = x.reshape(1, total)
        budget = max(128, (_TARGET_BLOCK_BYTES // (itemsize * sub)) // 128 * 128)
        tc = total if total <= budget else budget
        grid = (pl.cdiv(total, tc),)
        spec = pl.BlockSpec((1, tc), lambda i: (0, i))
        out_shape = jax.ShapeDtypeStruct((1, total), x.dtype)

    out2 = pl.pallas_call(
        _tiled_copy_kernel,
        out_shape=out_shape,
        grid=grid,
        in_specs=[spec],
        out_specs=spec,
        compiler_params=pltpu.CompilerParams(
            dimension_semantics=("parallel",),
            vmem_limit_bytes=_VMEM_LIMIT_BYTES,
        ),
        cost_estimate=pl.CostEstimate(
            flops=0, transcendentals=0, bytes_accessed=2 * total * itemsize),
    )(x2)
    return out2.reshape(orig_shape)


# ----------------------------------------------------------------------------
# Public wrapper (matches Identity.forward semantics).
# ----------------------------------------------------------------------------
def identity(x: jax.Array, *, materialize: bool = True) -> jax.Array:
    """Pallas equivalent of Identity.forward(input) -> input.

    materialize=False is the true (zero-copy) identity; materialize=True
    returns a freshly materialized copy via a pure HBM->HBM DMA kernel.
    """
    if not materialize or x.ndim == 0 or x.size == 0:
        return x  # zero bytes moved beats any kernel
    try:
        return _identity_dma(x)
    except Exception:
        # TODO(synk): drop this fallback once HBM->HBM async-copy lowering is
        # guaranteed on all deployed jaxlib versions.
        return _identity_tiled(x)


if __name__ == "__main__":
    key = jax.random.PRNGKey(0)
    k0, k1, k2 = jax.random.split(key, 3)

    # NCHW input as the SwiftNet ResNet module would see it.
    x = jax.random.normal(k0, (2, 4, 16, 16), dtype=jnp.float32)
    y = identity(x)
    jax.block_until_ready(y)
    assert y.shape == x.shape and y.dtype == x.dtype
    assert bool(jnp.array_equal(y, x))

    # Odd (non multiple-of-128) shape: single whole-array DMA.
    x_odd = jax.random.normal(k1, (3, 5, 7), dtype=jnp.float32)
    y_odd = identity(x_odd)
    jax.block_until_ready(y_odd)
    assert y_odd.shape == x_odd.shape and bool(jnp.array_equal(y_odd, x_odd))

    # Large enough to exercise the multi-chunk (2 x ~8 MiB) DMA path.
    x_big = jax.random.normal(k2, (4096, 1024), dtype=jnp.float32)
    y_big = identity(x_big)
    jax.block_until_ready(y_big)
    assert bool(jnp.array_equal(y_big, x_big))

    print("KERNEL_OK")
</pallas_src>

<mosaic_0001>
module attributes {stable_mosaic.version = 11 : i64} {
  func.func @kernel(%arg0: memref<2x4x16x16xf32, #tpu.memory_space<any>>, %arg1: memref<2x4x16x16xf32, #tpu.memory_space<any>>, %arg2: memref<1x!tpu.dma_semaphore, #tpu.memory_space<semaphore_mem>>) attributes {dimension_semantics = [], scalar_prefetch = 0 : i64, scratch_operands = 1 : i64, tpu.core_type = #tpu.core_type<tc>} {
    %c0_i32 = arith.constant 0 : i32
    %0 = tpu.memref_slice %arg2[%c0_i32] : memref<1x!tpu.dma_semaphore, #tpu.memory_space<semaphore_mem>> -> memref<1x!tpu.dma_semaphore, #tpu.memory_space<semaphore_mem>>
    %1 = tpu.memref_squeeze %0 : memref<1x!tpu.dma_semaphore, #tpu.memory_space<semaphore_mem>> -> memref<!tpu.dma_semaphore, #tpu.memory_space<semaphore_mem>>
    tpu.enqueue_dma source(%arg0 : memref<2x4x16x16xf32, #tpu.memory_space<any>>) target(%arg1 : memref<2x4x16x16xf32, #tpu.memory_space<any>>) target_semaphore(%1 : memref<!tpu.dma_semaphore, #tpu.memory_space<semaphore_mem>>)
    %c0_i32_0 = arith.constant 0 : i32
    %2 = tpu.memref_slice %arg2[%c0_i32_0] : memref<1x!tpu.dma_semaphore, #tpu.memory_space<semaphore_mem>> -> memref<1x!tpu.dma_semaphore, #tpu.memory_space<semaphore_mem>>
    %3 = tpu.memref_squeeze %2 : memref<1x!tpu.dma_semaphore, #tpu.memory_space<semaphore_mem>> -> memref<!tpu.dma_semaphore, #tpu.memory_space<semaphore_mem>>
    tpu.wait_dma2 semaphore(%3 : memref<!tpu.dma_semaphore, #tpu.memory_space<semaphore_mem>>) src(%arg0 : memref<2x4x16x16xf32, #tpu.memory_space<any>>) dst(%arg1 : memref<2x4x16x16xf32, #tpu.memory_space<any>>)
    return
  }
}

module attributes {stable_mosaic.version = 11 : i64} {
  func.func @_tiled_copy_kernel(%arg0: i32, %arg1: memref<1x2048xf32, #tpu.memory_space<vmem>>, %arg2: memref<1x2048xf32, #tpu.memory_space<vmem>>) attributes {dimension_semantics = [#tpu.dimension_semantics<parallel>], iteration_bounds = array<i64: 1>, scalar_prefetch = 0 : i64, scratch_operands = 0 : i64, tpu.core_type = #tpu.core_type<tc>, window_params = [{transform_indices = @transform_0, window_bounds = array<i64: 1, 2048>}, {transform_indices = @transform_1, window_bounds = array<i64: 1, 2048>}]} {
    %c0 = arith.constant 0 : index
    %c0_0 = arith.constant 0 : index
    %0 = vector.load %arg1[%c0, %c0_0] : memref<1x2048xf32, #tpu.memory_space<vmem>>, vector<1x2048xf32>
    %c0_1 = arith.constant 0 : index
    %c0_2 = arith.constant 0 : index
    %1 = vector.load %arg2[%c0_1, %c0_2] : memref<1x2048xf32, #tpu.memory_space<vmem>>, vector<1x2048xf32>
    tpu.vector_store %arg2[%c0_1, %c0_2], %0 {strides = array<i32>} : memref<1x2048xf32, #tpu.memory_space<vmem>>, vector<1x2048xf32>,
    return
  }
  func.func @transform_0(%arg0: i32) -> (i32, i32) {
    %c0_i32 = arith.constant 0 : i32
    %c0_i32_0 = arith.constant 0 : i32
    return %arg0, %c0_i32 : i32, i32
  }
  func.func @transform_1(%arg0: i32) -> (i32, i32) {
    %c0_i32 = arith.constant 0 : i32
    %c0_i32_0 = arith.constant 0 : i32
    return %arg0, %c0_i32 : i32, i32
  }
}

</mosaic_0001>

<bundles_post_ra>
// kernel: tpu_custom_call.1
= control target key start
LH: loop header
LB: loop body
LE: loop exit
PB: predicated region body
PF: predicated region fallthrough
CT: control target
= control target key end

     0   :  { %s36_s6 = smov [#allocation2]   ;;  %s37_s7 = smov [#allocation3]   ;;  %s55_s0 = inlined_call_operand.hbm [shape: f32[2,4,16,16], index: 0, kind: input, shape index: {}]   ;;  %s56_s1 = inlined_call_operand.hbm [shape: f32[2,4,16,16], index: 1, kind: output, shape index: {}]  }
   0x1   :  { %s38_s8 = smov 0  }
   0x2   :  { %18 = dma.general %s55_s0, 2048, %s56_s1, %s36_s6, %s37_s7, [#allocation4], %s38_s8, 0  }
   0x3   :  { %34 = dma.done.wait [#allocation2], 2048 }
   0x4   :  { %35 = vsyncadd [#allocation2], 4294965248 }
   0x5   :  { %24 = vsyncmov [#allocation2] }
   0x8   :  { %s25_s13 = vpop.sfrf %24 }
   0x9   :  { %p30_p0 = scmp.ne.s32.totalorder %s25_s13, 0 }
   0xb   :  { %29 = shalt.err (%p30_p0)  }

// kernel: tpu_custom_call.1
= control target key start
LH: loop header
LB: loop body
LE: loop exit
PB: predicated region body
PF: predicated region fallthrough
CT: control target
= control target key end

     0   :  { %6 = vsyncpa [#allocation3], 0  ;;  %s126_s0 = inlined_call_operand.hbm [shape: f32[1,2048], index: 0, kind: input, shape index: {}]   ;;  %s127_s1 = inlined_call_operand.hbm [shape: f32[1,2048], index: 1, kind: output, shape index: {}]  }
   0x1   :  { %7 = vsyncpa [#allocation4], 0  ;;  %s90_s6 = smov [#allocation2]   ;;  %s42_s10 = scalar_lea.hbm %s126_s0, 256 }
   0x2   :  { %s14_s7 = sshll.u32 %s90_s6, 4  ;;  %p43_p0 = scmp.ne.s32.totalorder %s126_s0, %s42_s10  ;;  %s15_s7 = int_to_ptr.vmem [resolvable:$true] %s14_s7 }
   0x3   :  { %p46_p1 = scmp.lt.u32.totalorder %s42_s10, %s126_s0 }
   0x5   :  { %p48_p2 = pnand %p46_p1, %p43_p0 }
   0x7   :  { %51 = shalt.err (!%p48_p2)
}
   0x8   :  { %s52_s15 = scalar_lea.vmem %s15_s7, 256  ;;  %p57_p4 = scmp.lt.s32.totalorder %s15_s7, %s15_s7 }
   0x9   :  { %p53_p3 = scmp.ne.s32.totalorder %s15_s7, %s52_s15  ;;  %p58_p5 = scmp.lt.s32.totalorder %s52_s15, %s52_s15 }
   0xb   :  { %p59_p6 = por %p58_p5, %p57_p4 }
   0xd   :  { %p60_p7 = pnand %p59_p6, %p53_p3 }
   0xf   :  { %63 = shalt.err (!%p60_p7)
}
  0x10   :  { %17 = dma.hbm_to_vmem [thread:$0]  %s126_s0, 256, %s15_s7, [#allocation3]  }
  0x11   :  { %86 = dma.done.wait [#allocation3], 256  }
  0x12   :  { %87 = vsyncadd [#allocation3], 4294967040  ;;  %s91_s18 = smov [#allocation5]   ;;  %v21_v0 = vld [vmem:[#allocation2] sm:$0xff]  ;;  %v22_v1 = vld [vmem:[#allocation2 + $0x8] sm:$0xff] }
  0x13   :  { %s31_s19 = sshll.u32 %s91_s18, 4  ;;  %23 = vst [vmem:[#allocation5] sm:$0xff] %v21_v0  ;;  %24 = vst [vmem:[#allocation5 + $0x8] sm:$0xff] %v22_v1  ;;  %s32_s19 = int_to_ptr.vmem [resolvable:$true] %s31_s19 }
  0x14   :  { %s64_s20 = scalar_lea.vmem %s32_s19, 256  ;;  %p69_p9 = scmp.lt.s32.totalorder %s32_s19, %s32_s19 }
  0x15   :  { %p65_p8 = scmp.ne.s32.totalorder %s32_s19, %s64_s20  ;;  %p70_p10 = scmp.lt.s32.totalorder %s64_s20, %s64_s20 }
  0x17   :  { %p71_p11 = por %p70_p10, %p69_p9 }
  0x19   :  { %p72_p12 = pnand %p71_p11, %p65_p8 }
  0x1b   :  { %75 = shalt.err (!%p72_p12)
}
  0x1c   :  { %s76_s0 = scalar_lea.hbm %s127_s1, 256 }
  0x1d   :  { %p77_p13 = scmp.ne.s32.totalorder %s127_s1, %s76_s0  ;;  %p80_p0 = scmp.lt.u32.totalorder %s76_s0, %s127_s1 }
  0x1f   :  { %p82_p1 = pnand %p80_p0, %p77_p13 }
  0x21   :  { %85 = shalt.err (!%p82_p1)
}
  0x22   :  { %34 = dma.vmem_to_hbm [thread:$0]  %s32_s19, 256, %s127_s1, [#allocation4]  }
  0x23   :  { %88 = dma.done.wait [#allocation4], 256  }
  0x24   :  { %89 = vsyncadd [#allocation4], 4294967040 }
  0x25   :  { %38 = vsyncpa [#allocation3], 1 }
  0x26   :  { %39 = vsyncpa [#allocation4], 1 }

</bundles_post_ra>
